<compile_context>
chip_gen: v7x
topology: tpu7x:2x2x1
jax: 0.10.0
libtpu: 0.0.40
codegen_flags: <defaults>
</compile_context>

<pallas_src>
import functools

import jax
import jax.numpy as jnp
from jax.experimental import pallas as pl
from jax.experimental.pallas import tpu as pltpu


# ---------------------------------------------------------------------------
# Kernels
# ---------------------------------------------------------------------------

def _packed_ce_kernel(pred_ref, lab_ref, out_ref, acc_ref, *, c):
    """CE sum over lane-packed logits.

    Each 128-lane row of `pred_ref` holds G = 128 // c logical rows, each
    occupying c consecutive lanes.  `lab_ref` carries that row's label
    repeated over its c lanes (int8, -1 for batch-padding rows).
    """
    t = pl.program_id(1)

    @pl.when(t == 0)
    def _init():
        acc_ref[...] = jnp.zeros_like(acc_ref)

    x = pred_ref[...].astype(jnp.float32)            # (TN, 128)
    lab = lab_ref[...].astype(jnp.int32)             # (TN, 128)
    lane = jax.lax.broadcasted_iota(jnp.int32, x.shape, 1)
    valid = lab >= 0                                  # padding rows carry -1

    # Per-segment (c consecutive lanes) max via an XOR butterfly of lane
    # rolls; segments are c-aligned and c is a power of two, so every
    # exchange partner (lane XOR s) stays inside the segment.
    m = x
    s = 1
    while s < c:
        fwd = pltpu.roll(m, shift=128 - s, axis=1)    # value from lane l + s
        bwd = pltpu.roll(m, shift=s, axis=1)          # value from lane l - s
        m = jnp.maximum(m, jnp.where((lane & s) == 0, fwd, bwd))
        s *= 2

    e = jnp.exp(x - m)                                # dense 128-lane EUP work

    # Per-segment sum of exp with the same butterfly.
    se = e
    s = 1
    while s < c:
        fwd = pltpu.roll(se, shift=128 - s, axis=1)
        bwd = pltpu.roll(se, shift=s, axis=1)
        se = se + jnp.where((lane & s) == 0, fwd, bwd)
        s *= 2

    # Every lane of a segment now holds that logical row's logsumexp; scale by
    # 1/c when accumulating so each logical row is counted once.  Batch-padded
    # rows are masked to exactly zero.
    lse_lane = jnp.where(valid, jnp.log(se) + m, 0.0)
    tgt_lane = jnp.where((lane & (c - 1)) == lab, x, 0.0)
    acc_ref[...] += lse_lane * (1.0 / c) - tgt_lane

    @pl.when(t == pl.num_programs(1) - 1)
    def _finalize():
        out_ref[...] = jnp.full((1, 1, 1), jnp.sum(acc_ref[...]),
                                dtype=out_ref.dtype)


def _rowwise_ce_kernel(pred_ref, lab_ref, out_ref, acc_ref):
    """Fallback CE sum for C >= 128 (or C not dividing 128): one row per logit row."""
    t = pl.program_id(1)

    @pl.when(t == 0)
    def _init():
        acc_ref[...] = jnp.zeros_like(acc_ref)

    x = pred_ref[...].astype(jnp.float32)             # (TN, C)
    lab = lab_ref[...]                                 # (TN, 1) int32
    m = jnp.max(x, axis=1, keepdims=True)
    lse = m + jnp.log(jnp.sum(jnp.exp(x - m), axis=1, keepdims=True))
    cls = jax.lax.broadcasted_iota(jnp.int32, x.shape, 1)
    tgt = jnp.sum(jnp.where(cls == lab, x, 0.0), axis=1, keepdims=True)
    acc_ref[...] += jnp.where(lab >= 0, lse - tgt, 0.0)   # pad rows (-1) -> 0

    @pl.when(t == pl.num_programs(1) - 1)
    def _finalize():
        out_ref[...] = jnp.full((1, 1, 1), jnp.sum(acc_ref[...]),
                                dtype=out_ref.dtype)


# ---------------------------------------------------------------------------
# Wrapper helpers
# ---------------------------------------------------------------------------

def _round_up(x, m):
    return ((x + m - 1) // m) * m


def _tpu_vmem_and_cores():
    """(physical VMEM bytes, TensorCores/chip), conservative on failure."""
    vmem = 64 * 1024 * 1024          # v7x-safe fallback
    cores = 1
    try:
        info = pltpu.get_tpu_info()
        vmem = int(getattr(info, "vmem_capacity_bytes", vmem) or vmem)
    except Exception:
        pass
    try:
        kind = jax.devices()[0].device_kind.lower()
        if "v7" in kind or "7x" in kind:
            cores = 2                # only v7x has 2 TCs sharing a chip
    except Exception:
        pass
    return vmem, cores


def _pick_batch_tile(rows, row_in_bytes, row_tmp_bytes, num_shards,
                     vmem_budget_bytes, max_tile_rows, align):
    """Largest `align`-multiple row tile whose double-buffered inputs plus
    in-kernel f32 temporaries/accumulator fit the VMEM budget."""
    bytes_per_row = 2 * row_in_bytes + row_tmp_bytes
    fit_rows = max(align, vmem_budget_bytes // bytes_per_row)
    need_rows = _round_up(pl.cdiv(rows, num_shards), align)
    tile = min(max_tile_rows, fit_rows, need_rows)
    return max(align, (tile // align) * align)


# ---------------------------------------------------------------------------
# Public entry point
# ---------------------------------------------------------------------------

def focal_loss(y_pred, y_true, alpha=1.0, gamma=2.0, *,
               logits=False,                # unused in reference forward
               reduce=True,                 # scalar either way (matches ref)
               num_shards=None,             # default: TensorCores per chip
               batch_tile=None,
               max_tile_rows=8192,
               vmem_limit_bytes=None):
    """y_pred: (N, C) logits (any float dtype); y_true: (N,) int labels. Scalar out."""
    del logits  # the reference forward always applies CrossEntropyLoss
    n, c = y_pred.shape

    vmem_cap, n_cores = _tpu_vmem_and_cores()
    if vmem_limit_bytes is None:
        vmem_limit_bytes = min(vmem_cap * 3 // 4, 100 * 1024 * 1024)
    input_budget = vmem_limit_bytes * 9 // 10
    if num_shards is None:
        num_shards = n_cores

    pred_isz = jnp.dtype(y_pred.dtype).itemsize
    packed = (c < 128) and (128 % c == 0)
    if packed:
        g = 128 // c                               # logical rows per 128-lane row
        rows = pl.cdiv(n, g)
        align = 32                                 # int8 label tiling (32, 128)
        row_in = 128 * pred_isz + 128 * 1          # logits + int8 labels per row
        row_tmp = 7 * 128 * 4                      # f32 temporaries + accumulator
    else:
        g = 1
        rows = n
        align = 8
        c_lanes = _round_up(c, 128)
        row_in = c_lanes * pred_isz + 128 * 4
        row_tmp = 4 * c_lanes * 4 + 128 * 4

    num_shards = max(1, min(int(num_shards), pl.cdiv(rows, align)))
    if batch_tile is None:
        batch_tile = _pick_batch_tile(rows, row_in, row_tmp, num_shards,
                                      input_budget, max_tile_rows, align)
    assert batch_tile % align == 0

    tiles_per_shard = pl.cdiv(pl.cdiv(rows, num_shards), batch_tile)
    rows_padded = num_shards * tiles_per_shard * batch_tile
    n_padded = rows_padded * g

    labels = y_true.astype(jnp.int32)
    pad = n_padded - n
    if pad > 0:
        y_pred = jnp.pad(y_pred, ((0, pad), (0, 0)))
        labels = jnp.pad(labels, (0, pad), constant_values=-1)

    if packed:
        preds_in = y_pred.reshape(rows_padded, 128)          # free reshape
        labs_in = jnp.repeat(labels, c).reshape(rows_padded, 128).astype(jnp.int8)
        kernel = functools.partial(_packed_ce_kernel, c=c)
        in_specs = [
            pl.BlockSpec((batch_tile, 128),
                         lambda s, t: (s * tiles_per_shard + t, 0)),
            pl.BlockSpec((batch_tile, 128),
                         lambda s, t: (s * tiles_per_shard + t, 0)),
        ]
        scratch = [pltpu.VMEM((batch_tile, 128), jnp.float32)]
    else:
        preds_in = y_pred
        labs_in = labels.reshape(rows_padded, 1)
        kernel = _rowwise_ce_kernel
        in_specs = [
            pl.BlockSpec((batch_tile, c),
                         lambda s, t: (s * tiles_per_shard + t, 0)),
            pl.BlockSpec((batch_tile, 1),
                         lambda s, t: (s * tiles_per_shard + t, 0)),
        ]
        scratch = [pltpu.VMEM((batch_tile, 1), jnp.float32)]

    partials = pl.pallas_call(
        kernel,
        out_shape=jax.ShapeDtypeStruct((num_shards, 1, 1), jnp.float32),
        grid_spec=pltpu.PrefetchScalarGridSpec(
            num_scalar_prefetch=0,
            grid=(num_shards, tiles_per_shard),
            in_specs=in_specs,
            out_specs=pl.BlockSpec((1, 1, 1), lambda s, t: (s, 0, 0)),
            scratch_shapes=scratch),
        compiler_params=pltpu.CompilerParams(
            dimension_semantics=("parallel", "arbitrary"),
            vmem_limit_bytes=int(vmem_limit_bytes)),
    )(preds_in, labs_in)

    # Tiny O(1) finalize in plain JAX (also combines per-core partials on v7x).
    ce = jnp.sum(partials) / jnp.float32(n)
    pt = jnp.exp(-ce)
    f_loss = alpha * (1.0 - pt) ** gamma * ce
    return jnp.mean(f_loss) if reduce else f_loss


# ---------------------------------------------------------------------------
# Reference + smoke test
# ---------------------------------------------------------------------------

def _focal_loss_ref(y_pred, y_true, alpha=1.0, gamma=2.0):
    logp = jax.nn.log_softmax(y_pred.astype(jnp.float32), axis=-1)
    nll = -jnp.take_along_axis(logp, y_true.astype(jnp.int32)[:, None], axis=-1)[:, 0]
    ce = jnp.mean(nll)
    pt = jnp.exp(-ce)
    return alpha * (1.0 - pt) ** gamma * ce


if __name__ == "__main__":
    key = jax.random.PRNGKey(0)
    k1, k2, k3, k4 = jax.random.split(key, 4)

    # Shipped-style shape: C=8 -> lane-packed path (G = 16 rows per vreg row).
    N, C = 64, 8
    y_pred = jax.random.normal(k1, (N, C), dtype=jnp.float32)
    y_true = jax.random.randint(k2, (N,), 0, C, dtype=jnp.int32)
    loss = focal_loss(y_pred, y_true, alpha=1.0, gamma=2.0)
    jax.block_until_ready(loss)
    ref = _focal_loss_ref(y_pred, y_true, 1.0, 2.0)
    assert abs(float(loss) - float(ref)) < 1e-3, (float(loss), float(ref))

    # Fallback path: C does not divide 128 -> row-wise kernel.
    N2, C2 = 40, 100
    y_pred2 = jax.random.normal(k3, (N2, C2), dtype=jnp.float32)
    y_true2 = jax.random.randint(k4, (N2,), 0, C2, dtype=jnp.int32)
    loss2 = focal_loss(y_pred2, y_true2, alpha=0.5, gamma=2.0)
    jax.block_until_ready(loss2)
    ref2 = _focal_loss_ref(y_pred2, y_true2, 0.5, 2.0)
    assert abs(float(loss2) - float(ref2)) < 1e-3, (float(loss2), float(ref2))

    print("KERNEL_OK")
</pallas_src>

<mosaic_0001>
module attributes {stable_mosaic.version = 11 : i64} {
  func.func @_packed_ce_kernel(%arg0: i32, %arg1: i32, %arg2: memref<32x128xf32, #tpu.memory_space<vmem>>, %arg3: memref<32x128xi8, #tpu.memory_space<vmem>>, %arg4: memref<1x1x1xf32, #tpu.memory_space<vmem>>, %arg5: memref<32x128xf32, #tpu.memory_space<vmem>>) attributes {dimension_semantics = [#tpu.dimension_semantics<parallel>, #tpu.dimension_semantics<arbitrary>], iteration_bounds = array<i64: 1, 1>, scalar_prefetch = 0 : i64, scratch_operands = 1 : i64, tpu.core_type = #tpu.core_type<tc>, window_params = [{transform_indices = @transform_0, window_bounds = array<i64: 32, 128>}, {transform_indices = @transform_1, window_bounds = array<i64: 32, 128>}, {transform_indices = @transform_2, window_bounds = array<i64: 1, 1, 1>}]} {
    %c0_i32 = arith.constant 0 : i32
    %0 = arith.cmpi eq, %arg1, %c0_i32 : i32
    %1 = arith.extui %0 : i1 to i32
    %c0_i32_0 = arith.constant 0 : i32
    %2 = arith.cmpi ne, %1, %c0_i32_0 : i32
    scf.if %2 {
      %cst_31 = arith.constant 0.000000e+00 : f32
      %77 = vector.broadcast %cst_31 : f32 to vector<32x128xf32>
      %c0_32 = arith.constant 0 : index
      %c0_33 = arith.constant 0 : index
      %78 = vector.load %arg5[%c0_32, %c0_33] : memref<32x128xf32, #tpu.memory_space<vmem>>, vector<32x128xf32>
      tpu.vector_store %arg5[%c0_32, %c0_33], %77 {strides = array<i32>} : memref<32x128xf32, #tpu.memory_space<vmem>>, vector<32x128xf32>,
    } else {
    }
    %c0 = arith.constant 0 : index
    %c0_1 = arith.constant 0 : index
    %3 = vector.load %arg2[%c0, %c0_1] : memref<32x128xf32, #tpu.memory_space<vmem>>, vector<32x128xf32>
    %c0_2 = arith.constant 0 : index
    %c0_3 = arith.constant 0 : index
    %4 = vector.load %arg3[%c0_2, %c0_3] : memref<32x128xi8, #tpu.memory_space<vmem>>, vector<32x128xi8>
    %5 = arith.extsi %4 : vector<32x128xi8> to vector<32x128xi32>
    %6 = tpu.iota {dimensions = array<i32: 1>} : vector<32x128xi32>
    %c0_i32_4 = arith.constant 0 : i32
    %7 = vector.broadcast %c0_i32_4 : i32 to vector<32x128xi32>
    %8 = arith.cmpi sge, %5, %7 : vector<32x128xi32>
    %c127_i32 = arith.constant 127 : i32
    %9 = tpu.dynamic_rotate %3 by %c127_i32 dim 1 : vector<32x128xf32>, i32 -> vector<32x128xf32>
    %c1_i32 = arith.constant 1 : i32
    %10 = tpu.dynamic_rotate %3 by %c1_i32 dim 1 : vector<32x128xf32>, i32 -> vector<32x128xf32>
    %c1_i32_5 = arith.constant 1 : i32
    %11 = vector.broadcast %c1_i32_5 : i32 to vector<32x128xi32>
    %12 = arith.andi %6, %11 : vector<32x128xi32>
    %c0_i32_6 = arith.constant 0 : i32
    %13 = vector.broadcast %c0_i32_6 : i32 to vector<32x128xi32>
    %14 = arith.cmpi eq, %12, %13 : vector<32x128xi32>
    %15 = arith.select %14, %9, %10 : vector<32x128xi1>, vector<32x128xf32>
    %16 = arith.maximumf %3, %15 : vector<32x128xf32>
    %c126_i32 = arith.constant 126 : i32
    %17 = tpu.dynamic_rotate %16 by %c126_i32 dim 1 : vector<32x128xf32>, i32 -> vector<32x128xf32>
    %c2_i32 = arith.constant 2 : i32
    %18 = tpu.dynamic_rotate %16 by %c2_i32 dim 1 : vector<32x128xf32>, i32 -> vector<32x128xf32>
    %c2_i32_7 = arith.constant 2 : i32
    %19 = vector.broadcast %c2_i32_7 : i32 to vector<32x128xi32>
    %20 = arith.andi %6, %19 : vector<32x128xi32>
    %c0_i32_8 = arith.constant 0 : i32
    %21 = vector.broadcast %c0_i32_8 : i32 to vector<32x128xi32>
    %22 = arith.cmpi eq, %20, %21 : vector<32x128xi32>
    %23 = arith.select %22, %17, %18 : vector<32x128xi1>, vector<32x128xf32>
    %24 = arith.maximumf %16, %23 : vector<32x128xf32>
    %c124_i32 = arith.constant 124 : i32
    %25 = tpu.dynamic_rotate %24 by %c124_i32 dim 1 : vector<32x128xf32>, i32 -> vector<32x128xf32>
    %c4_i32 = arith.constant 4 : i32
    %26 = tpu.dynamic_rotate %24 by %c4_i32 dim 1 : vector<32x128xf32>, i32 -> vector<32x128xf32>
    %c4_i32_9 = arith.constant 4 : i32
    %27 = vector.broadcast %c4_i32_9 : i32 to vector<32x128xi32>
    %28 = arith.andi %6, %27 : vector<32x128xi32>
    %c0_i32_10 = arith.constant 0 : i32
    %29 = vector.broadcast %c0_i32_10 : i32 to vector<32x128xi32>
    %30 = arith.cmpi eq, %28, %29 : vector<32x128xi32>
    %31 = arith.select %30, %25, %26 : vector<32x128xi1>, vector<32x128xf32>
    %32 = arith.maximumf %24, %31 : vector<32x128xf32>
    %33 = arith.subf %3, %32 : vector<32x128xf32>
    %34 = math.exp %33 : vector<32x128xf32>
    %c127_i32_11 = arith.constant 127 : i32
    %35 = tpu.dynamic_rotate %34 by %c127_i32_11 dim 1 : vector<32x128xf32>, i32 -> vector<32x128xf32>
    %c1_i32_12 = arith.constant 1 : i32
    %36 = tpu.dynamic_rotate %34 by %c1_i32_12 dim 1 : vector<32x128xf32>, i32 -> vector<32x128xf32>
    %c1_i32_13 = arith.constant 1 : i32
    %37 = vector.broadcast %c1_i32_13 : i32 to vector<32x128xi32>
    %38 = arith.andi %6, %37 : vector<32x128xi32>
    %c0_i32_14 = arith.constant 0 : i32
    %39 = vector.broadcast %c0_i32_14 : i32 to vector<32x128xi32>
    %40 = arith.cmpi eq, %38, %39 : vector<32x128xi32>
    %41 = arith.select %40, %35, %36 : vector<32x128xi1>, vector<32x128xf32>
    %42 = arith.addf %34, %41 : vector<32x128xf32>
    %c126_i32_15 = arith.constant 126 : i32
    %43 = tpu.dynamic_rotate %42 by %c126_i32_15 dim 1 : vector<32x128xf32>, i32 -> vector<32x128xf32>
    %c2_i32_16 = arith.constant 2 : i32
    %44 = tpu.dynamic_rotate %42 by %c2_i32_16 dim 1 : vector<32x128xf32>, i32 -> vector<32x128xf32>
    %c2_i32_17 = arith.constant 2 : i32
    %45 = vector.broadcast %c2_i32_17 : i32 to vector<32x128xi32>
    %46 = arith.andi %6, %45 : vector<32x128xi32>
    %c0_i32_18 = arith.constant 0 : i32
    %47 = vector.broadcast %c0_i32_18 : i32 to vector<32x128xi32>
    %48 = arith.cmpi eq, %46, %47 : vector<32x128xi32>
    %49 = arith.select %48, %43, %44 : vector<32x128xi1>, vector<32x128xf32>
    %50 = arith.addf %42, %49 : vector<32x128xf32>
    %c124_i32_19 = arith.constant 124 : i32
    %51 = tpu.dynamic_rotate %50 by %c124_i32_19 dim 1 : vector<32x128xf32>, i32 -> vector<32x128xf32>
    %c4_i32_20 = arith.constant 4 : i32
    %52 = tpu.dynamic_rotate %50 by %c4_i32_20 dim 1 : vector<32x128xf32>, i32 -> vector<32x128xf32>
    %c4_i32_21 = arith.constant 4 : i32
    %53 = vector.broadcast %c4_i32_21 : i32 to vector<32x128xi32>
    %54 = arith.andi %6, %53 : vector<32x128xi32>
    %c0_i32_22 = arith.constant 0 : i32
    %55 = vector.broadcast %c0_i32_22 : i32 to vector<32x128xi32>
    %56 = arith.cmpi eq, %54, %55 : vector<32x128xi32>
    %57 = arith.select %56, %51, %52 : vector<32x128xi1>, vector<32x128xf32>
    %58 = arith.addf %50, %57 : vector<32x128xf32>
    %59 = math.log %58 : vector<32x128xf32>
    %60 = arith.addf %59, %32 : vector<32x128xf32>
    %cst = arith.constant 0.000000e+00 : f32
    %61 = vector.broadcast %cst : f32 to vector<32x128xf32>
    %62 = arith.select %8, %60, %61 : vector<32x128xi1>, vector<32x128xf32>
    %c7_i32 = arith.constant 7 : i32
    %63 = vector.broadcast %c7_i32 : i32 to vector<32x128xi32>
    %64 = arith.andi %6, %63 : vector<32x128xi32>
    %65 = arith.cmpi eq, %64, %5 : vector<32x128xi32>
    %cst_23 = arith.constant 0.000000e+00 : f32
    %66 = vector.broadcast %cst_23 : f32 to vector<32x128xf32>
    %67 = arith.select %65, %3, %66 : vector<32x128xi1>, vector<32x128xf32>
    %c0_24 = arith.constant 0 : index
    %c0_25 = arith.constant 0 : index
    %68 = vector.load %arg5[%c0_24, %c0_25] : memref<32x128xf32, #tpu.memory_space<vmem>>, vector<32x128xf32>
    %cst_26 = arith.constant 1.250000e-01 : f32
    %69 = vector.broadcast %cst_26 : f32 to vector<32x128xf32>
    %70 = arith.mulf %62, %69 : vector<32x128xf32>
    %71 = arith.subf %70, %67 : vector<32x128xf32>
    %72 = arith.addf %68, %71 : vector<32x128xf32>
    %c0_27 = arith.constant 0 : index
    %c0_28 = arith.constant 0 : index
    %73 = vector.load %arg5[%c0_27, %c0_28] : memref<32x128xf32, #tpu.memory_space<vmem>>, vector<32x128xf32>
    tpu.vector_store %arg5[%c0_27, %c0_28], %72 {strides = array<i32>} : memref<32x128xf32, #tpu.memory_space<vmem>>, vector<32x128xf32>,
    %c0_i32_29 = arith.constant 0 : i32
    %74 = arith.cmpi eq, %arg1, %c0_i32_29 : i32
    %75 = arith.extui %74 : i1 to i32
    %c0_i32_30 = arith.constant 0 : i32
    %76 = arith.cmpi ne, %75, %c0_i32_30 : i32
    scf.if %76 {
      %c0_31 = arith.constant 0 : index
      %c0_32 = arith.constant 0 : index
      %77 = vector.load %arg5[%c0_31, %c0_32] : memref<32x128xf32, #tpu.memory_space<vmem>>, vector<32x128xf32>
      %78 = vector.shape_cast %77 : vector<32x128xf32> to vector<1x32x128xf32>
      %cst_33 = arith.constant dense<0.000000e+00> : vector<1xf32>
      %79 = vector.multi_reduction <add>, %78, %cst_33 [1, 2] : vector<1x32x128xf32> to vector<1xf32>
      %80 = vector.shape_cast %79 : vector<1xf32> to vector<1x1x1xf32>
      %81 = vector.extract %80[0, 0, 0] : f32 from vector<1x1x1xf32>
      %82 = vector.broadcast %81 : f32 to vector<1x1x1xf32>
      %c0_34 = arith.constant 0 : index
      %c0_35 = arith.constant 0 : index
      %c0_36 = arith.constant 0 : index
      %83 = vector.load %arg4[%c0_34, %c0_35, %c0_36] : memref<1x1x1xf32, #tpu.memory_space<vmem>>, vector<1x1x1xf32>
      tpu.vector_store %arg4[%c0_34, %c0_35, %c0_36], %82 {strides = array<i32>} : memref<1x1x1xf32, #tpu.memory_space<vmem>>, vector<1x1x1xf32>,
    } else {
    }
    return
  }
  func.func @transform_0(%arg0: i32, %arg1: i32) -> (i32, i32) {
    %c1_i32 = arith.constant 1 : i32
    %0 = arith.muli %arg0, %c1_i32 : i32
    %1 = arith.addi %0, %arg1 : i32
    %c0_i32 = arith.constant 0 : i32
    %c0_i32_0 = arith.constant 0 : i32
    return %1, %c0_i32 : i32, i32
  }
  func.func @transform_1(%arg0: i32, %arg1: i32) -> (i32, i32) {
    %c1_i32 = arith.constant 1 : i32
    %0 = arith.muli %arg0, %c1_i32 : i32
    %1 = arith.addi %0, %arg1 : i32
    %c0_i32 = arith.constant 0 : i32
    %c0_i32_0 = arith.constant 0 : i32
    return %1, %c0_i32 : i32, i32
  }
  func.func @transform_2(%arg0: i32, %arg1: i32) -> (i32, i32, i32) {
    %c0_i32 = arith.constant 0 : i32
    %c0_i32_0 = arith.constant 0 : i32
    %c0_i32_1 = arith.constant 0 : i32
    return %arg0, %c0_i32, %c0_i32_0 : i32, i32, i32
  }
}

</mosaic_0001>

<bundles_post_ra>
// kernel: tpu_custom_call.1
= control target key start
LH: loop header
LB: loop body
LE: loop exit
PB: predicated region body
PF: predicated region fallthrough
CT: control target
= control target key end

     0   :  { %7 = vsyncpa [#allocation4], 0  ;;  %s661_s0 = inlined_call_operand.hbm [shape: f32[32,128], index: 0, kind: input, shape index: {}]   ;;  %s662_s1 = inlined_call_operand.hbm [shape: s8[32,128], index: 1, kind: input, shape index: {}]   ;;  %s663_s2 = inlined_call_operand.hbm [shape: f32[1,1,1], index: 2, kind: output, shape index: {}]  }
   0x1   :  { %8 = vsyncpa [#allocation7], 0 }
   0x2   :  { %9 = vsyncpa [#allocation5], 0  ;;  %s417_s9 = smov [#allocation3]   ;;  %s345_s13 = scalar_lea.hbm %s661_s0, 512 }
   0x3   :  { %s19_s10 = sshll.u32 %s417_s9, 4  ;;  %p346_p0 = scmp.ne.s32.totalorder %s661_s0, %s345_s13  ;;  %s20_s10 = int_to_ptr.vmem [resolvable:$true] %s19_s10 }
   0x4   :  { %p349_p1 = scmp.lt.u32.totalorder %s345_s13, %s661_s0 }
   0x6   :  { %p351_p2 = pnand %p349_p1, %p346_p0 }
   0x8   :  { %354 = shalt.err (!%p351_p2)
}
   0x9   :  { %s355_s18 = scalar_lea.vmem %s20_s10, 512  ;;  %p360_p4 = scmp.lt.s32.totalorder %s20_s10, %s20_s10 }
   0xa   :  { %p356_p3 = scmp.ne.s32.totalorder %s20_s10, %s355_s18  ;;  %p361_p5 = scmp.lt.s32.totalorder %s355_s18, %s355_s18 }
   0xc   :  { %p362_p6 = por %p361_p5, %p360_p4 }
   0xe   :  { %p363_p7 = pnand %p362_p6, %p356_p3 }
  0x10   :  { %366 = shalt.err (!%p363_p7)
}
  0x11   :  { %s418_s19 = smov 128   ;;  %s419_s20 = smov 8  }
  0x12   :  { %25 = dma.hbm_to_vmem [thread:$0]  %s661_s0, 512, %s20_s10, [#allocation4], %s418_s19, %s418_s19, %s419_s20  }
  0x13   :  { %s420_s23 = smov [#allocation6]   ;;  %s367_s27 = scalar_lea.hbm %s662_s1, 128 }
  0x14   :  { %s35_s24 = sshll.u32 %s420_s23, 4  ;;  %p368_p8 = scmp.ne.s32.totalorder %s662_s1, %s367_s27  ;;  %s36_s24 = int_to_ptr.vmem [resolvable:$true] %s35_s24 }
  0x15   :  { %p371_p9 = scmp.lt.u32.totalorder %s367_s27, %s662_s1 }
  0x17   :  { %p373_p10 = pnand %p371_p9, %p368_p8 }
  0x19   :  { %376 = shalt.err (!%p373_p10)
}
  0x1a   :  { %s377_s4 = scalar_lea.vmem %s36_s24, 128  ;;  %p382_p12 = scmp.lt.s32.totalorder %s36_s24, %s36_s24 }
  0x1b   :  { %p378_p11 = scmp.ne.s32.totalorder %s36_s24, %s377_s4  ;;  %p383_p13 = scmp.lt.s32.totalorder %s377_s4, %s377_s4 }
  0x1d   :  { %p384_p0 = por %p383_p13, %p382_p12 }
  0x1f   :  { %p385_p1 = pnand %p384_p0, %p378_p11 }
  0x21   :  { %388 = shalt.err (!%p385_p1)
}
  0x22   :  { %38 = dma.hbm_to_vmem [thread:$0]  %s662_s1, 128, %s36_s24, [#allocation7]  }
  0x23   :  { %411 = dma.done.wait [#allocation4], 512  }
  0x24   :  { %412 = vsyncadd [#allocation4], 4294966784 }
  0x25   :  { %413 = dma.done.wait [#allocation7], 128  }
  0x26   :  { %414 = vsyncadd [#allocation7], 4294967168  ;;  %v467_v0 = vld [vmem:[#allocation3] sm:$0xff]  ;;  %s421_s6 = smov 1   ;;  %s422_s7 = smov 127   ;;  %v473_v1 = vld [vmem:[#allocation3 + $0x8] sm:$0xff]  ;;  %v65_v4 = vlaneseq }
  0x27   :  { %79 = vrot.lane.b32.xlu1 %v467_v0, %s421_s6  ;;  %71 = vrot.lane.b32.xlu0 %v467_v0, %s422_s7  ;;  %v479_v2 = vld [vmem:[#allocation3 + $0x10] sm:$0xff]  ;;  %v485_v3 = vld [vmem:[#allocation3 + $0x18] sm:$0xff]  ;;  %s423_s1 = smov 126   ;;  %s424_s8 = smov 2   ;;  %vm298_vm11 = vcmask 0  }
  0x28   :  { %v491_v5 = vand.u32 127, %v65_v4  ;;  %s425_s9 = smov 124   ;;  %s426_s10 = smov 4  }
  0x29   :  { %s427_s11 = smov [#allocation8]  }
  0x2a   :  { %v87_v6 = vand.u32 1, %v491_v5  ;;  %v113_v24 = vand.u32 2, %v491_v5  ;;  %v139_v42 = vand.u32 4, %v491_v5  ;;  %s306_s12 = sshll.u32 %s427_s11, 4  ;;  %s307_s12 = int_to_ptr.vmem [resolvable:$true] %s306_s12 }
  0x2b   :  { %81 = vrot.lane.b32.xlu1 %v473_v1, %s421_s6  ;;  %73 = vrot.lane.b32.xlu0 %v473_v1, %s422_s7  ;;  %s389_s14 = scalar_lea.vmem %s307_s12, 16  ;;  %s393_s15 = scalar_lea.vmem %s307_s12, 32 }
  0x2c   :  { %vm494_vm0 = vcmp.eq.s32.totalorder %v87_v6, 0  ;;  %vm519_vm1 = vcmp.eq.s32.totalorder %v113_v24, 0  ;;  %vm540_vm2 = vcmp.eq.s32.totalorder %v139_v42, 0  ;;  %p390_p2 = scmp.ne.s32.totalorder %s307_s12, %s389_s14  ;;  %p394_p3 = scmp.lt.s32.totalorder %s307_s12, %s307_s12 }
  0x2d   :  { %p395_p4 = scmp.lt.s32.totalorder %s393_s15, %s389_s14 }
  0x2f   :  { %83 = vrot.lane.b32.xlu1 %v479_v2, %s421_s6  ;;  %75 = vrot.lane.b32.xlu0 %v479_v2, %s422_s7  ;;  %p396_p5 = por %p395_p4, %p394_p3 }
  0x31   :  { %p397_p6 = pnand %p396_p5, %p390_p2 }
  0x33   :  { %85 = vrot.lane.b32.xlu1 %v485_v3, %s421_s6  ;;  %77 = vrot.lane.b32.xlu0 %v485_v3, %s422_s7 }
  0x99   :  { %v80_v8 = vpop.permute.xlu1 %79  ;;  %v72_v9 = vpop.permute.xlu0 %71 }
  0x9a   :  { %v89_v10 = vsel %vm494_vm0, %v72_v9, %v80_v8 }
  0x9b   :  { %v93_v11 = vmax.f32 %v467_v0, %v89_v10 }
  0x9d   :  { %v82_v12 = vpop.permute.xlu1 %81  ;;  %97 = vrot.lane.b32.xlu0 %v93_v11, %s423_s1  ;;  %v74_v13 = vpop.permute.xlu0 %73 }
  0x9e   :  { %v90_v14 = vsel %vm494_vm0, %v74_v13, %v82_v12 }
  0x9f   :  { %v94_v15 = vmax.f32 %v473_v1, %v90_v14 }
  0xa1   :  { %105 = vrot.lane.b32.xlu0 %v93_v11, %s424_s8  ;;  %99 = vrot.lane.b32.xlu1 %v94_v15, %s423_s1  ;;  %v84_v16 = vpop.permute.xlu1 %83  ;;  %v76_v17 = vpop.permute.xlu0 %75 }
  0xa2   :  { %v91_v18 = vsel %vm494_vm0, %v76_v17, %v84_v16 }
  0xa3   :  { %v95_v19 = vmax.f32 %v479_v2, %v91_v18 }
  0xa5   :  { %107 = vrot.lane.b32.xlu1 %v94_v15, %s424_s8  ;;  %v86_v20 = vpop.permute.xlu1 %85  ;;  %101 = vrot.lane.b32.xlu0 %v95_v19, %s423_s1  ;;  %v78_v21 = vpop.permute.xlu0 %77 }
  0xa6   :  { %v92_v22 = vsel %vm494_vm0, %v78_v21, %v86_v20 }
  0xa7   :  { %v96_v23 = vmax.f32 %v485_v3, %v92_v22 }
  0xa9   :  { %109 = vrot.lane.b32.xlu1 %v95_v19, %s424_s8  ;;  %103 = vrot.lane.b32.xlu0 %v96_v23, %s423_s1 }
  0xad   :  { %111 = vrot.lane.b32.xlu1 %v96_v23, %s424_s8 }
 0x10f   :  { %v98_v25 = vpop.permute.xlu0 %97 }
 0x113   :  { %v100_v27 = vpop.permute.xlu1 %99  ;;  %v106_v28 = vpop.permute.xlu0 %105 }
 0x114   :  { %v115_v29 = vsel %vm519_vm1, %v98_v25, %v106_v28 }
 0x115   :  { %v119_v30 = vmax.f32 %v93_v11, %v115_v29 }
 0x117   :  { %v108_v31 = vpop.permute.xlu1 %107  ;;  %123 = vrot.lane.b32.xlu0 %v119_v30, %s425_s9  ;;  %v102_v32 = vpop.permute.xlu0 %101 }
 0x118   :  { %v116_v33 = vsel %vm519_vm1, %v100_v27, %v108_v31 }
 0x119   :  { %v120_v34 = vmax.f32 %v94_v15, %v116_v33 }
 0x11b   :  { %v110_v35 = vpop.permute.xlu1 %109  ;;  %125 = vrot.lane.b32.xlu1 %v120_v34, %s425_s9  ;;  %131 = vrot.lane.b32.xlu0 %v119_v30, %s426_s10  ;;  %v104_v38 = vpop.permute.xlu0 %103 }
 0x11c   :  { %v117_v36 = vsel %vm519_vm1, %v102_v32, %v110_v35 }
 0x11d   :  { %v121_v37 = vmax.f32 %v95_v19, %v117_v36 }
 0x11f   :  { %133 = vrot.lane.b32.xlu1 %v120_v34, %s426_s10  ;;  %v112_v39 = vpop.permute.xlu1 %111  ;;  %127 = vrot.lane.b32.xlu0 %v121_v37, %s425_s9 }
 0x120   :  { %v118_v40 = vsel %vm519_vm1, %v104_v38, %v112_v39 }
 0x121   :  { %v122_v41 = vmax.f32 %v96_v23, %v118_v40 }
 0x123   :  { %135 = vrot.lane.b32.xlu1 %v121_v37, %s426_s10  ;;  %129 = vrot.lane.b32.xlu0 %v122_v41, %s425_s9 }
 0x127   :  { %137 = vrot.lane.b32.xlu1 %v122_v41, %s426_s10 }
 0x189   :  { %v124_v43 = vpop.permute.xlu0 %123 }
 0x18d   :  { %v126_v45 = vpop.permute.xlu1 %125  ;;  %v132_v46 = vpop.permute.xlu0 %131 }
 0x18e   :  { %v141_v47 = vsel %vm540_vm2, %v124_v43, %v132_v46 }
 0x18f   :  { %v546_v48 = vmax.f32 %v119_v30, %v141_v47 }
 0x191   :  { %v149_v49 = vsub.f32 %v467_v0, %v546_v48  ;;  %v134_v50 = vpop.permute.xlu1 %133  ;;  %v128_v54 = vpop.permute.xlu0 %127 }
 0x192   :  { %v142_v51 = vsel %vm540_vm2, %v126_v45, %v134_v50 }
 0x193   :  { %v153_v52 = vmul.f32 1.442695, %v149_v49  ;;  %v552_v53 = vmax.f32 %v120_v34, %v142_v51 }
 0x195   :  { %329 = vpow2.f32 %v153_v52  ;;  %v150_v55 = vsub.f32 %v473_v1, %v552_v53  ;;  %v136_v56 = vpop.permute.xlu1 %135  ;;  %v130_v61 = vpop.permute.xlu0 %129 }
 0x196   :  { %v143_v57 = vsel %vm540_vm2, %v128_v54, %v136_v56 }
 0x197   :  { %v155_v58 = vmul.f32 1.442695, %v150_v55  ;;  %v558_v59 = vmax.f32 %v121_v37, %v143_v57 }
 0x199   :  { %331 = vpow2.f32 %v155_v58  ;;  %v151_v60 = vsub.f32 %v479_v2, %v558_v59  ;;  %v138_v62 = vpop.permute.xlu1 %137 }
 0x19a   :  { %v144_v63 = vsel %vm540_vm2, %v130_v61, %v138_v62 }
 0x19b   :  { %v157_v4 = vmul.f32 1.442695, %v151_v60  ;;  %v564_v6 = vmax.f32 %v122_v41, %v144_v63 }
 0x19d   :  { %333 = vpow2.f32 %v157_v4  ;;  %v152_v8 = vsub.f32 %v485_v3, %v564_v6  ;;  %v60_v4 = vld [vmem:[#allocation6] sm:$0xff] }
 0x19f   :  { %v330_v9 = vpop.eup %329  ;;  %v159_v10 = vmul.f32 1.442695, %v152_v8 }
 0x1a0   :  { %161 = vrot.lane.b32.xlu0 %v330_v9, %s422_s7 }
 0x1a1   :  { %335 = vpow2.f32 %v159_v10 }
 0x1a3   :  { %v332_v11 = vpop.eup %331 }
 0x1a4   :  { %163 = vrot.lane.b32.xlu1 %v332_v11, %s422_s7  ;;  %169 = vrot.lane.b32.xlu0 %v330_v9, %s421_s6 }
 0x1a7   :  { %v334_v12 = vpop.eup %333 }
 0x1a8   :  { %171 = vrot.lane.b32.xlu1 %v332_v11, %s421_s6  ;;  %165 = vrot.lane.b32.xlu0 %v334_v12, %s422_s7 }
 0x1ab   :  { %v336_v13 = vpop.eup %335 }
 0x1ac   :  { %173 = vrot.lane.b32.xlu1 %v334_v12, %s421_s6  ;;  %167 = vrot.lane.b32.xlu0 %v336_v13, %s422_s7 }
 0x1b0   :  { %175 = vrot.lane.b32.xlu1 %v336_v13, %s421_s6 }
 0x212   :  { %v162_v14 = vpop.permute.xlu0 %161 }
 0x216   :  { %v164_v15 = vpop.permute.xlu1 %163  ;;  %v170_v16 = vpop.permute.xlu0 %169 }
 0x217   :  { %v177_v17 = vsel %vm494_vm0, %v162_v14, %v170_v16  ;;  %v249_v16 = vand.u32 7, %v491_v5 }
 0x218   :  { %v181_v18 = vadd.f32 %v330_v9, %v177_v17  ;;  %v63_v17 = vunpack.c.2.s8 %v60_v4 }
 0x21a   :  { %v172_v19 = vpop.permute.xlu1 %171  ;;  %185 = vrot.lane.b32.xlu0 %v181_v18, %s423_s1  ;;  %v166_v22 = vpop.permute.xlu0 %165  ;;  %vm69_vm7 = vcmp.ge.s32.totalorder %v63_v17, 0  ;;  %vm633_vm8 = vcmp.eq.s32.totalorder %v249_v16, %v63_v17 }
 0x21b   :  { %v178_v20 = vsel %vm494_vm0, %v164_v15, %v172_v19 }
 0x21c   :  { %v182_v21 = vadd.f32 %v332_v11, %v178_v20  ;;  %v61_v11 = vunpack.c.0.s8 %v60_v4 }
 0x21e   :  { %v174_v23 = vpop.permute.xlu1 %173  ;;  %187 = vrot.lane.b32.xlu1 %v182_v21, %s423_s1  ;;  %193 = vrot.lane.b32.xlu0 %v181_v18, %s424_s8  ;;  %v168_v27 = vpop.permute.xlu0 %167  ;;  %vm618_vm3 = vcmp.ge.s32.totalorder %v61_v11, 0  ;;  %vm629_vm6 = vcmp.eq.s32.totalorder %v249_v16, %v61_v11 }
 0x21f   :  { %v179_v24 = vsel %vm494_vm0, %v166_v22, %v174_v23  ;;  %v64_v23 = vunpack.c.3.s8 %v60_v4 }
 0x220   :  { %v183_v25 = vadd.f32 %v334_v12, %v179_v24  ;;  %v62_v12 = vunpack.c.1.s8 %v60_v4 }
 0x221   :  { %vm70_vm9 = vcmp.ge.s32.totalorder %v64_v23, 0  ;;  %vm253_vm10 = vcmp.eq.s32.totalorder %v249_v16, %v64_v23 }
 0x222   :  { %195 = vrot.lane.b32.xlu1 %v182_v21, %s424_s8  ;;  %v176_v28 = vpop.permute.xlu1 %175  ;;  %189 = vrot.lane.b32.xlu0 %v183_v25, %s423_s1  ;;  %vm68_vm4 = vcmp.ge.s32.totalorder %v62_v12, 0  ;;  %vm623_vm5 = vcmp.eq.s32.totalorder %v249_v16, %v62_v12 }
 0x223   :  { %v180_v29 = vsel %vm494_vm0, %v168_v27, %v176_v28  ;;  %v255_v27 = vsel %vm623_vm5, %v473_v1, 0.0 }
 0x224   :  { %v184_v30 = vadd.f32 %v336_v13, %v180_v29 }
 0x226   :  { %197 = vrot.lane.b32.xlu1 %v183_v25, %s424_s8  ;;  %191 = vrot.lane.b32.xlu0 %v184_v30, %s423_s1 }
 0x22a   :  { %199 = vrot.lane.b32.xlu1 %v184_v30, %s424_s8 }
 0x28c   :  { %v186_v31 = vpop.permute.xlu0 %185 }
 0x290   :  { %v188_v32 = vpop.permute.xlu1 %187  ;;  %v194_v33 = vpop.permute.xlu0 %193 }
 0x291   :  { %v201_v34 = vsel %vm519_vm1, %v186_v31, %v194_v33  ;;  %v256_v33 = vsel %vm633_vm8, %v479_v2, 0.0 }
 0x292   :  { %v205_v35 = vadd.f32 %v201_v34, %v181_v18 }
 0x294   :  { %v196_v36 = vpop.permute.xlu1 %195  ;;  %209 = vrot.lane.b32.xlu0 %v205_v35, %s425_s9  ;;  %v190_v38 = vpop.permute.xlu0 %189 }
 0x295   :  { %v202_v7 = vsel %vm519_vm1, %v188_v32, %v196_v36  ;;  %v254_v32 = vsel %vm629_vm6, %v467_v0, 0.0 }
 0x296   :  { %v206_v37 = vadd.f32 %v202_v7, %v182_v21 }
 0x298   :  { %v198_v39 = vpop.permute.xlu1 %197  ;;  %211 = vrot.lane.b32.xlu1 %v206_v37, %s425_s9  ;;  %217 = vrot.lane.b32.xlu0 %v205_v35, %s426_s10  ;;  %v192_v42 = vpop.permute.xlu0 %191 }
 0x299   :  { %v203_v40 = vsel %vm519_vm1, %v190_v38, %v198_v39 }
 0x29a   :  { %v207_v41 = vadd.f32 %v203_v40, %v183_v25 }
 0x29c   :  { %219 = vrot.lane.b32.xlu1 %v206_v37, %s426_s10  ;;  %v200_v43 = vpop.permute.xlu1 %199  ;;  %213 = vrot.lane.b32.xlu0 %v207_v41, %s425_s9 }
 0x29d   :  { %v204_v45 = vsel %vm519_vm1, %v192_v42, %v200_v43 }
 0x29e   :  { %v208_v46 = vadd.f32 %v204_v45, %v184_v30 }
 0x2a0   :  { %221 = vrot.lane.b32.xlu1 %v207_v41, %s426_s10  ;;  %215 = vrot.lane.b32.xlu0 %v208_v46, %s425_s9 }
 0x2a4   :  { %223 = vrot.lane.b32.xlu1 %v208_v46, %s426_s10 }
 0x306   :  { %v210_v47 = vpop.permute.xlu0 %209 }
 0x30a   :  { %v212_v49 = vpop.permute.xlu1 %211  ;;  %v218_v50 = vpop.permute.xlu0 %217 }
 0x30b   :  { %v225_v51 = vsel %vm540_vm2, %v210_v47, %v218_v50 }
 0x30c   :  { %v229_v52 = vadd.f32 %v225_v51, %v205_v35 }
 0x30e   :  { %337 = vlog2.f32 %v229_v52  ;;  %v220_v54 = vpop.permute.xlu1 %219  ;;  %v214_v56 = vpop.permute.xlu0 %213 }
 0x30f   :  { %v226_v26 = vsel %vm540_vm2, %v212_v49, %v220_v54 }
 0x310   :  { %v230_v55 = vadd.f32 %v226_v26, %v206_v37  ;;  %v257_v37 = vsel %vm253_vm10, %v485_v3, 0.0 }
 0x312   :  { %339 = vlog2.f32 %v230_v55  ;;  %v222_v57 = vpop.permute.xlu1 %221  ;;  %v216_v61 = vpop.permute.xlu0 %215 }
 0x313   :  { %v227_v58 = vsel %vm540_vm2, %v214_v56, %v222_v57 }
 0x314   :  { %v231_v60 = vadd.f32 %v227_v58, %v207_v41 }
 0x316   :  { %341 = vlog2.f32 %v231_v60  ;;  %v224_v62 = vpop.permute.xlu1 %223 }
 0x317   :  { %v228_v63 = vsel %vm540_vm2, %v216_v61, %v224_v62 }
 0x318   :  { %v338_v8 = vpop.eup %337  ;;  %v232_v9 = vadd.f32 %v228_v63, %v208_v46 }
 0x319   :  { %v234_v10 = vmul.f32 0.6931472, %v338_v8 }
 0x31a   :  { %343 = vlog2.f32 %v232_v9 }
 0x31b   :  { %v241_v14 = vadd.f32 %v234_v10, %v546_v48 }
 0x31c   :  { %v340_v13 = vpop.eup %339 }
 0x31d   :  { %v236_v15 = vmul.f32 0.6931472, %v340_v13  ;;  %v245_v48 = vsel %vm618_vm3, %v241_v14, 0.0 }
 0x31e   :  { %v262_v29 = vmul.f32 0.125, %v245_v48 }
 0x31f   :  { %v242_v44 = vadd.f32 %v236_v15, %v552_v53 }
 0x320   :  { %v342_v19 = vpop.eup %341  ;;  %v266_v36 = vsub.f32 %v262_v29, %v254_v32 }
 0x321   :  { %v238_v21 = vmul.f32 0.6931472, %v342_v19  ;;  %v246_v22 = vsel %vm68_vm4, %v242_v44, 0.0 }
 0x322   :  { %v263_v53 = vmul.f32 0.125, %v246_v22 }
 0x323   :  { %v243_v25 = vadd.f32 %v238_v21, %v558_v59 }
 0x324   :  { %v344_v28 = vpop.eup %343  ;;  %v267_v59 = vsub.f32 %v263_v53, %v255_v27 }
 0x325   :  { %v240_v30 = vmul.f32 0.6931472, %v344_v28  ;;  %v247_v31 = vsel %vm69_vm7, %v243_v25, 0.0 }
 0x326   :  { %v264_v34 = vmul.f32 0.125, %v247_v31  ;;  %v285_v39 = vadd.f32 %v267_v59, %v266_v36 }
 0x327   :  { %v244_v35 = vadd.f32 %v240_v30, %v564_v6 }
 0x328   :  { %v268_v1 = vsub.f32 %v264_v34, %v256_v33 }
 0x329   :  { %v248_v7 = vsel %vm70_vm9, %v244_v35, 0.0 }
 0x32a   :  { %v265_v38 = vmul.f32 0.125, %v248_v7  ;;  %v286_v41 = vadd.f32 %v285_v39, %v268_v1 }
 0x32c   :  { %v269_v40 = vsub.f32 %v265_v38, %v257_v37 }
 0x32e   :  { %v287_v0 = vadd.f32 %v286_v41, %v269_v40 }
 0x330   :  { %288 = vadd.xlane.f32.xlu0 %v287_v0 }
 0x3bd   :  { %v289_v42 = vpop.xlane.xlu0 %288 }
 0x3be   :  { %v290_v43 = vrot.slane %v289_v42, 4 }
 0x3c0   :  { %v291_v2 = vadd.f32 %v290_v43, %v289_v42 }
 0x3c2   :  { %v292_v45 = vrot.slane %v291_v2, 2 }
 0x3c4   :  { %v293_v46 = vadd.f32 %v292_v45, %v291_v2 }
 0x3c6   :  { %v294_v47 = vrot.slane %v293_v46, 1 }
 0x3c8   :  { %v295_v49 = vadd.f32 %v294_v47, %v293_v46 }
 0x3ca   :  { %316 = vpush %v295_v49 }
 0x3fb   :  { %s317_s13 = spop %316 }
 0x3fc   :  { %v297_v3 = vstv %s317_s13 }
 0x3fd   :  { %299 = vst.msk [vmem:[#allocation8] sm:$0x1] %vm298_vm11, %v297_v3 }
 0x3fe   :  { %400 = shalt.err (!%p397_p6)
}
 0x3ff   :  { %s401_s18 = scalar_lea.hbm %s663_s2, 16 }
 0x400   :  { %p402_p7 = scmp.ne.s32.totalorder %s663_s2, %s401_s18  ;;  %p405_p8 = scmp.lt.u32.totalorder %s401_s18, %s663_s2 }
 0x402   :  { %p407_p9 = pnand %p405_p8, %p402_p7 }
 0x404   :  { %410 = shalt.err (!%p407_p9)
}
 0x405   :  { %309 = dma.vmem_to_hbm [thread:$0]  %s307_s12, 16, %s663_s2, [#allocation5]  }
 0x406   :  { %415 = dma.done.wait [#allocation5], 16  }
 0x407   :  { %416 = vsyncadd [#allocation5], 4294967280 }
 0x408   :  { %313 = vsyncpa [#allocation4], 1 }
 0x409   :  { %314 = vsyncpa [#allocation7], 1 }
 0x40a   :  { %315 = vsyncpa [#allocation5], 1 }

</bundles_post_ra>
